<compile_context>
chip_gen: v7x
topology: tpu7x:2x2x1
jax: 0.10.0
libtpu: 0.0.40
codegen_flags: <defaults>
</compile_context>

<pallas_src>
import functools

import jax
import jax.numpy as jnp
from jax import lax
from jax.experimental import pallas as pl
from jax.experimental.pallas import tpu as pltpu

EPS = 1e-5
C_PAD = 128  # lane-dense channel padding (96 -> 128)


def _fused_kernel(x_ref, wbd_ref, shift_ref, wdw_ref, o_ref, ye_ref, yo_ref,
                  *, n_strips):
    """One batch element: pointwise conv (BN folded) + ReLU6 + depthwise 3x3/2."""
    hp1, wo, c = ye_ref.shape        # ye scratch: (H+1, Wo, C); row 0 = top pad
    h = hp1 - 1
    ho = h // 2
    ho_s = ho // n_strips            # output rows per strip
    h_s = 2 * ho_s                   # activation rows per strip

    # Zero only the padding regions, every step: with a "parallel" batch axis a
    # core's first iteration must not read stale VMEM, and the data regions are
    # fully overwritten below, so this is all the init that is needed.
    ye_ref[pl.ds(0, 1), :, :] = jnp.zeros((1, wo, c), jnp.float32)
    yo_ref[pl.ds(0, 1), :, :] = jnp.zeros((1, wo + 8, c), jnp.float32)
    yo_ref[:, pl.ds(0, 8), :] = jnp.zeros((hp1, 8, c), jnp.float32)

    wbd = wbd_ref[...]               # [2*Cin, 2*C] block-diag BN-folded 1x1 weight
    shift = shift_ref[...]           # [1, 2*C]     BN-folded shift (duplicated)
    wt = wdw_ref[...]                # [9, C]       depthwise taps
    # Hoist the per-tap reshapes (broadcast sources) out of the strip loop.
    w_taps = [wt[k].reshape(1, 1, c) for k in range(9)]

    # H-strip skewed schedule: the matmul/store of strip j+1 is independent of
    # the depthwise taps of strip j, so MXU and VALU work can overlap.
    for j in range(n_strips):
        r0 = j * h_s                 # first activation row of this strip
        # -- pointwise conv: single 256-column MXU matmul covering even + odd
        #    W columns, then BN shift and ReLU6.
        a = jnp.dot(x_ref[pl.ds(r0 * wo, h_s * wo), :], wbd,
                    preferred_element_type=jnp.float32)
        a = jnp.clip(a + shift, 0.0, 6.0)                    # [h_s*wo, 2*C]
        # even columns -> ye (rows 1..H), odd columns -> yo at col offset 8
        # (cols 0..7 are the zero left pad; col 7 = logical column -1).
        ye_ref[pl.ds(1 + r0, h_s), :, :] = a[:, :c].reshape(h_s, wo, c)
        yo_ref[pl.ds(1 + r0, h_s), pl.ds(8, wo), :] = a[:, c:].reshape(h_s, wo, c)

        # -- depthwise 3x3 stride-2 for this strip's output rows.  Row stride-2
        #    lives on the cheap outer axis; column taps are unit-stride.
        acc = None
        for kh in range(3):
            rows = pl.ds(2 * j * ho_s + kh, ho_s, stride=2)  # padded row indices
            y_l = yo_ref[rows, pl.ds(7, wo), :]   # input col 2*ow-1 (odd, left)
            y_c = ye_ref[rows, :, :]              # input col 2*ow   (even)
            y_r = yo_ref[rows, pl.ds(8, wo), :]   # input col 2*ow+1 (odd, right)
            t = y_l * w_taps[3 * kh + 0]
            acc = t if acc is None else acc + t
            acc = acc + y_c * w_taps[3 * kh + 1] + y_r * w_taps[3 * kh + 2]
        o_ref[pl.ds(j * ho_s, ho_s), :, :] = acc              # lane-dense [.,Wo,128]


def model_forward(x_nchw, w_pw, gamma, beta, w_dw):
    # x_nchw: [N, Cin, H, W]; w_pw: [Cout, Cin]; gamma/beta: [Cout]; w_dw: [Cout,3,3]
    n, cin, h, w = x_nchw.shape
    cout = w_pw.shape[0]
    assert h % 2 == 0 and w % 2 == 0, "kernel assumes even H, W"
    ho, wo = h // 2, w // 2
    c = C_PAD
    p_total = n * h * w

    # ---- BN batch statistics folded into the 1x1 weights (tiny XLA ops) ----
    # Exact because the 1x1 conv is linear: mean_y = mean_x @ W, var_y = W^T Cov W.
    x_nhwc = jnp.transpose(x_nchw, (0, 2, 3, 1)).astype(jnp.float32)   # [N,H,W,Cin]
    x_flat = x_nhwc.reshape(-1, cin)
    w1 = jnp.transpose(w_pw).astype(jnp.float32)                       # [Cin, Cout]
    mean_x = jnp.mean(x_flat, axis=0)                                  # [Cin]
    ex2 = jnp.dot(x_flat.T, x_flat, precision=lax.Precision.HIGHEST,
                  preferred_element_type=jnp.float32) / p_total        # [Cin, Cin]
    cov = ex2 - jnp.outer(mean_x, mean_x)
    mean_y = jnp.dot(mean_x, w1, precision=lax.Precision.HIGHEST)      # [Cout]
    var_y = jnp.maximum(
        jnp.sum(jnp.dot(cov, w1, precision=lax.Precision.HIGHEST) * w1, axis=0),
        0.0)                                                           # [Cout]
    scale = gamma.astype(jnp.float32) * lax.rsqrt(var_y + EPS)
    w1s = w1 * scale[None, :]                                          # folded weight
    shift = beta.astype(jnp.float32) - mean_y * scale                  # folded shift
    # TODO(synk): running_mean / running_var updates (momentum=0.1) not emitted.

    # Lane-dense packing (96 -> 128) and block-diagonal weight so even + odd
    # W-column activations are produced by one 256-column matmul.
    w1s_p = jnp.zeros((cin, c), jnp.float32).at[:, :cout].set(w1s)
    w_bd = (jnp.zeros((2 * cin, 2 * c), jnp.float32)
            .at[:cin, :c].set(w1s_p)
            .at[cin:, c:].set(w1s_p))
    shift_p = jnp.zeros((1, c), jnp.float32).at[0, :cout].set(shift)
    shift_cat = jnp.concatenate([shift_p, shift_p], axis=1)            # [1, 2*C]
    wdw_p = jnp.zeros((9, c), jnp.float32).at[:, :cout].set(
        jnp.transpose(w_dw, (1, 2, 0)).reshape(9, cout).astype(jnp.float32))

    # De-interleave W into even/odd columns and pack along channels -> [N, H*Wo, 32].
    x_even = x_nhwc[:, :, 0::2, :]
    x_odd = x_nhwc[:, :, 1::2, :]
    x_cat = jnp.concatenate([x_even, x_odd], axis=-1).reshape(n, h * wo, 2 * cin)

    # Number of H strips for MXU/VALU skewing inside the body.
    n_strips = 1
    for cand in (4, 2):
        if ho % cand == 0:
            n_strips = cand
            break

    kernel = functools.partial(_fused_kernel, n_strips=n_strips)

    # VMEM budget: x_cat blocks are lane-padded 32 -> 128 in VMEM (4x inflation),
    # double-buffered; ye/yo scratch; double-buffered output block; params + slack.
    vmem_est = 4 * (2 * h * wo * c
                    + (h + 1) * wo * c
                    + (h + 1) * (wo + 8) * c
                    + 2 * ho * wo * c) + (1 << 20)
    vmem_limit = max(32 * 1024 * 1024, (vmem_est * 5) // 4)

    out = pl.pallas_call(
        kernel,
        out_shape=jax.ShapeDtypeStruct((n, ho, wo, c), jnp.float32),
        grid=(n,),
        in_specs=[
            pl.BlockSpec((None, h * wo, 2 * cin), lambda i: (i, 0, 0)),
            pl.BlockSpec((2 * cin, 2 * c), lambda i: (0, 0)),   # constant index maps:
            pl.BlockSpec((1, 2 * c), lambda i: (0, 0)),         # params DMA'd once per
            pl.BlockSpec((9, c), lambda i: (0, 0)),             # core, stay VMEM-resident
        ],
        out_specs=pl.BlockSpec((None, ho, wo, c), lambda i: (i, 0, 0, 0)),
        scratch_shapes=[
            pltpu.VMEM((h + 1, wo, c), jnp.float32),        # even cols (+ top pad row)
            pltpu.VMEM((h + 1, wo + 8, c), jnp.float32),    # odd cols (+ top/left pad)
        ],
        # Batch elements are fully independent (BN already folded) -> megacore-
        # parallel on v7x, harmless elsewhere.
        compiler_params=pltpu.CompilerParams(
            dimension_semantics=("parallel",),
            vmem_limit_bytes=int(vmem_limit)),
    )(x_cat, w_bd, shift_cat, wdw_p)

    return jnp.transpose(out[:, :, :, :cout], (0, 3, 1, 2))   # back to NCHW


# ---------------------------------------------------------------------------
# Pure-JAX reference for correctness checking.
# ---------------------------------------------------------------------------
def reference(x, w_pw, gamma, beta, w_dw):
    cout = w_pw.shape[0]
    y = lax.conv_general_dilated(
        x, w_pw[:, :, None, None], (1, 1), "VALID",
        dimension_numbers=("NCHW", "OIHW", "NCHW"))
    mean = jnp.mean(y, axis=(0, 2, 3), keepdims=True)
    var = jnp.mean((y - mean) ** 2, axis=(0, 2, 3), keepdims=True)
    z = (y - mean) * lax.rsqrt(var + EPS) * gamma[None, :, None, None] \
        + beta[None, :, None, None]
    z = jnp.clip(z, 0.0, 6.0)
    out = lax.conv_general_dilated(
        z, w_dw[:, None, :, :], (2, 2), ((1, 1), (1, 1)),
        dimension_numbers=("NCHW", "OIHW", "NCHW"),
        feature_group_count=cout)
    return out


if __name__ == "__main__":
    key = jax.random.PRNGKey(0)
    k1, k2, k3, k4, k5 = jax.random.split(key, 5)

    # Small shapes consistent with the module (16 -> 96 channels, even spatial).
    N, Cin, H, W = 2, 16, 16, 16
    Cout = 96

    x = jax.random.normal(k1, (N, Cin, H, W), dtype=jnp.float32)
    w_pw = jax.random.normal(k2, (Cout, Cin), dtype=jnp.float32) * (1.0 / Cin ** 0.5)
    gamma = 0.5 + jax.random.uniform(k3, (Cout,), dtype=jnp.float32)
    beta = 0.1 * jax.random.normal(k4, (Cout,), dtype=jnp.float32)
    w_dw = jax.random.normal(k5, (Cout, 3, 3), dtype=jnp.float32) * (1.0 / 3.0)

    fwd = jax.jit(model_forward)
    out = jax.block_until_ready(fwd(x, w_pw, gamma, beta, w_dw))

    ref = reference(x, w_pw, gamma, beta, w_dw)
    assert out.shape == ref.shape == (N, Cout, H // 2, W // 2), (out.shape, ref.shape)
    max_err = float(jnp.max(jnp.abs(out - ref)))
    assert jnp.allclose(out, ref, atol=2e-3, rtol=2e-3), f"max abs err {max_err}"

    print("KERNEL_OK")
</pallas_src>

<mosaic_0001>
module attributes {stable_mosaic.version = 11 : i64} {
  func.func @_fused_kernel(%arg0: i32, %arg1: memref<1x128x32xf32, #tpu.memory_space<vmem>>, %arg2: memref<32x256xf32, #tpu.memory_space<vmem>>, %arg3: memref<1x256xf32, #tpu.memory_space<vmem>>, %arg4: memref<9x128xf32, #tpu.memory_space<vmem>>, %arg5: memref<1x8x8x128xf32, #tpu.memory_space<vmem>>, %arg6: memref<17x8x128xf32, #tpu.memory_space<vmem>>, %arg7: memref<17x16x128xf32, #tpu.memory_space<vmem>>) attributes {dimension_semantics = [#tpu.dimension_semantics<parallel>], iteration_bounds = array<i64: 2>, scalar_prefetch = 0 : i64, scratch_operands = 2 : i64, tpu.core_type = #tpu.core_type<tc>, window_params = [{transform_indices = @transform_0, window_bounds = array<i64: 1, 128, 32>}, {pipeline_mode = #tpu.pipeline_mode<synchronous>, transform_indices = @transform_1, window_bounds = array<i64: 32, 256>}, {pipeline_mode = #tpu.pipeline_mode<synchronous>, transform_indices = @transform_2, window_bounds = array<i64: 1, 256>}, {pipeline_mode = #tpu.pipeline_mode<synchronous>, transform_indices = @transform_3, window_bounds = array<i64: 9, 128>}, {transform_indices = @transform_4, window_bounds = array<i64: 1, 8, 8, 128>}]} {
    %cst = arith.constant 0.000000e+00 : f32
    %0 = vector.broadcast %cst : f32 to vector<1x8x128xf32>
    %c0 = arith.constant 0 : index
    %c0_0 = arith.constant 0 : index
    %c0_1 = arith.constant 0 : index
    %1 = vector.load %arg6[%c0, %c0_0, %c0_1] : memref<17x8x128xf32, #tpu.memory_space<vmem>>, vector<1x8x128xf32>
    tpu.vector_store %arg6[%c0, %c0_0, %c0_1], %0 {strides = array<i32>} : memref<17x8x128xf32, #tpu.memory_space<vmem>>, vector<1x8x128xf32>,
    %cst_2 = arith.constant 0.000000e+00 : f32
    %2 = vector.broadcast %cst_2 : f32 to vector<1x16x128xf32>
    %c0_3 = arith.constant 0 : index
    %c0_4 = arith.constant 0 : index
    %c0_5 = arith.constant 0 : index
    %3 = vector.load %arg7[%c0_3, %c0_4, %c0_5] : memref<17x16x128xf32, #tpu.memory_space<vmem>>, vector<1x16x128xf32>
    tpu.vector_store %arg7[%c0_3, %c0_4, %c0_5], %2 {strides = array<i32>} : memref<17x16x128xf32, #tpu.memory_space<vmem>>, vector<1x16x128xf32>,
    %cst_6 = arith.constant 0.000000e+00 : f32
    %4 = vector.broadcast %cst_6 : f32 to vector<17x8x128xf32>
    %c0_7 = arith.constant 0 : index
    %c0_8 = arith.constant 0 : index
    %c0_9 = arith.constant 0 : index
    %5 = vector.load %arg7[%c0_7, %c0_8, %c0_9] : memref<17x16x128xf32, #tpu.memory_space<vmem>>, vector<17x8x128xf32>
    tpu.vector_store %arg7[%c0_7, %c0_8, %c0_9], %4 {strides = array<i32>} : memref<17x16x128xf32, #tpu.memory_space<vmem>>, vector<17x8x128xf32>,
    %c0_10 = arith.constant 0 : index
    %c0_11 = arith.constant 0 : index
    %6 = vector.load %arg2[%c0_10, %c0_11] : memref<32x256xf32, #tpu.memory_space<vmem>>, vector<32x256xf32>
    %c0_12 = arith.constant 0 : index
    %c0_13 = arith.constant 0 : index
    %7 = vector.load %arg3[%c0_12, %c0_13] : memref<1x256xf32, #tpu.memory_space<vmem>>, vector<1x256xf32>
    %c0_14 = arith.constant 0 : index
    %c0_15 = arith.constant 0 : index
    %8 = vector.load %arg4[%c0_14, %c0_15] : memref<9x128xf32, #tpu.memory_space<vmem>>, vector<9x128xf32>
    %9 = vector.extract_strided_slice %8 {offsets = [0, 0], sizes = [1, 128], strides = [1, 1]} : vector<9x128xf32> to vector<1x128xf32>
    %10 = vector.shape_cast %9 : vector<1x128xf32> to vector<128xf32>
    %11 = vector.shape_cast %10 : vector<128xf32> to vector<1x1x128xf32>
    %12 = vector.extract_strided_slice %8 {offsets = [1, 0], sizes = [1, 128], strides = [1, 1]} : vector<9x128xf32> to vector<1x128xf32>
    %13 = vector.shape_cast %12 : vector<1x128xf32> to vector<128xf32>
    %14 = vector.shape_cast %13 : vector<128xf32> to vector<1x1x128xf32>
    %15 = vector.extract_strided_slice %8 {offsets = [2, 0], sizes = [1, 128], strides = [1, 1]} : vector<9x128xf32> to vector<1x128xf32>
    %16 = vector.shape_cast %15 : vector<1x128xf32> to vector<128xf32>
    %17 = vector.shape_cast %16 : vector<128xf32> to vector<1x1x128xf32>
    %18 = vector.extract_strided_slice %8 {offsets = [3, 0], sizes = [1, 128], strides = [1, 1]} : vector<9x128xf32> to vector<1x128xf32>
    %19 = vector.shape_cast %18 : vector<1x128xf32> to vector<128xf32>
    %20 = vector.shape_cast %19 : vector<128xf32> to vector<1x1x128xf32>
    %21 = vector.extract_strided_slice %8 {offsets = [4, 0], sizes = [1, 128], strides = [1, 1]} : vector<9x128xf32> to vector<1x128xf32>
    %22 = vector.shape_cast %21 : vector<1x128xf32> to vector<128xf32>
    %23 = vector.shape_cast %22 : vector<128xf32> to vector<1x1x128xf32>
    %24 = vector.extract_strided_slice %8 {offsets = [5, 0], sizes = [1, 128], strides = [1, 1]} : vector<9x128xf32> to vector<1x128xf32>
    %25 = vector.shape_cast %24 : vector<1x128xf32> to vector<128xf32>
    %26 = vector.shape_cast %25 : vector<128xf32> to vector<1x1x128xf32>
    %27 = vector.extract_strided_slice %8 {offsets = [6, 0], sizes = [1, 128], strides = [1, 1]} : vector<9x128xf32> to vector<1x128xf32>
    %28 = vector.shape_cast %27 : vector<1x128xf32> to vector<128xf32>
    %29 = vector.shape_cast %28 : vector<128xf32> to vector<1x1x128xf32>
    %30 = vector.extract_strided_slice %8 {offsets = [7, 0], sizes = [1, 128], strides = [1, 1]} : vector<9x128xf32> to vector<1x128xf32>
    %31 = vector.shape_cast %30 : vector<1x128xf32> to vector<128xf32>
    %32 = vector.shape_cast %31 : vector<128xf32> to vector<1x1x128xf32>
    %33 = vector.extract_strided_slice %8 {offsets = [8, 0], sizes = [1, 128], strides = [1, 1]} : vector<9x128xf32> to vector<1x128xf32>
    %34 = vector.shape_cast %33 : vector<1x128xf32> to vector<128xf32>
    %35 = vector.shape_cast %34 : vector<128xf32> to vector<1x1x128xf32>
    %c0_16 = arith.constant 0 : index
    %c0_17 = arith.constant 0 : index
    %c0_18 = arith.constant 0 : index
    %36 = vector.load %arg1[%c0_16, %c0_17, %c0_18] : memref<1x128x32xf32, #tpu.memory_space<vmem>>, vector<1x32x32xf32>
    %37 = vector.shape_cast %36 : vector<1x32x32xf32> to vector<32x32xf32>
    %cst_19 = arith.constant dense<0.000000e+00> : vector<32x256xf32>
    %38 = tpu.matmul %37, %6, %cst_19 {dimension_numbers = #tpu.dot_dimension_numbers<[1], [0], [0], [1], [0, 0, 1, 1], [], []>} : vector<32x32xf32>, vector<32x256xf32>, vector<32x256xf32> -> vector<32x256xf32>
    %39 = vector.broadcast %7 : vector<1x256xf32> to vector<32x256xf32>
    %40 = arith.addf %38, %39 : vector<32x256xf32>
    %cst_20 = arith.constant 0.000000e+00 : f32
    %cst_21 = arith.constant 6.000000e+00 : f32
    %41 = vector.broadcast %cst_20 : f32 to vector<32x256xf32>
    %42 = arith.maximumf %41, %40 : vector<32x256xf32>
    %43 = vector.broadcast %cst_21 : f32 to vector<32x256xf32>
    %44 = arith.minimumf %43, %42 : vector<32x256xf32>
    %45 = vector.extract_strided_slice %44 {offsets = [0, 0], sizes = [32, 128], strides = [1, 1]} : vector<32x256xf32> to vector<32x128xf32>
    %46 = vector.shape_cast %45 : vector<32x128xf32> to vector<4x8x128xf32>
    %c1 = arith.constant 1 : index
    %c0_22 = arith.constant 0 : index
    %c0_23 = arith.constant 0 : index
    %47 = vector.load %arg6[%c1, %c0_22, %c0_23] : memref<17x8x128xf32, #tpu.memory_space<vmem>>, vector<4x8x128xf32>
    tpu.vector_store %arg6[%c1, %c0_22, %c0_23], %46 {strides = array<i32>} : memref<17x8x128xf32, #tpu.memory_space<vmem>>, vector<4x8x128xf32>,
    %48 = vector.extract_strided_slice %44 {offsets = [0, 128], sizes = [32, 128], strides = [1, 1]} : vector<32x256xf32> to vector<32x128xf32>
    %49 = vector.shape_cast %48 : vector<32x128xf32> to vector<4x8x128xf32>
    %c1_24 = arith.constant 1 : index
    %c8 = arith.constant 8 : index
    %c0_25 = arith.constant 0 : index
    %50 = vector.load %arg7[%c1_24, %c8, %c0_25] : memref<17x16x128xf32, #tpu.memory_space<vmem>>, vector<4x8x128xf32>
    tpu.vector_store %arg7[%c1_24, %c8, %c0_25], %49 {strides = array<i32>} : memref<17x16x128xf32, #tpu.memory_space<vmem>>, vector<4x8x128xf32>,
    %c0_26 = arith.constant 0 : index
    %c7 = arith.constant 7 : index
    %c0_27 = arith.constant 0 : index
    %51 = tpu.strided_load %arg7[%c0_26, %c7, %c0_27] {strides = array<i32: 2, 1, 1>} : memref<17x16x128xf32, #tpu.memory_space<vmem>>, vector<2x8x128xf32>
    %c0_28 = arith.constant 0 : index
    %c0_29 = arith.constant 0 : index
    %c0_30 = arith.constant 0 : index
    %52 = tpu.strided_load %arg6[%c0_28, %c0_29, %c0_30] {strides = array<i32: 2, 1, 1>} : memref<17x8x128xf32, #tpu.memory_space<vmem>>, vector<2x8x128xf32>
    %c0_31 = arith.constant 0 : index
    %c8_32 = arith.constant 8 : index
    %c0_33 = arith.constant 0 : index
    %53 = tpu.strided_load %arg7[%c0_31, %c8_32, %c0_33] {strides = array<i32: 2, 1, 1>} : memref<17x16x128xf32, #tpu.memory_space<vmem>>, vector<2x8x128xf32>
    %54 = vector.broadcast %11 : vector<1x1x128xf32> to vector<2x8x128xf32>
    %55 = arith.mulf %51, %54 : vector<2x8x128xf32>
    %56 = vector.broadcast %14 : vector<1x1x128xf32> to vector<2x8x128xf32>
    %57 = arith.mulf %52, %56 : vector<2x8x128xf32>
    %58 = arith.addf %55, %57 : vector<2x8x128xf32>
    %59 = vector.broadcast %17 : vector<1x1x128xf32> to vector<2x8x128xf32>
    %60 = arith.mulf %53, %59 : vector<2x8x128xf32>
    %61 = arith.addf %58, %60 : vector<2x8x128xf32>
    %c1_34 = arith.constant 1 : index
    %c7_35 = arith.constant 7 : index
    %c0_36 = arith.constant 0 : index
    %62 = tpu.strided_load %arg7[%c1_34, %c7_35, %c0_36] {strides = array<i32: 2, 1, 1>} : memref<17x16x128xf32, #tpu.memory_space<vmem>>, vector<2x8x128xf32>
    %c1_37 = arith.constant 1 : index
    %c0_38 = arith.constant 0 : index
    %c0_39 = arith.constant 0 : index
    %63 = tpu.strided_load %arg6[%c1_37, %c0_38, %c0_39] {strides = array<i32: 2, 1, 1>} : memref<17x8x128xf32, #tpu.memory_space<vmem>>, vector<2x8x128xf32>
    %c1_40 = arith.constant 1 : index
    %c8_41 = arith.constant 8 : index
    %c0_42 = arith.constant 0 : index
    %64 = tpu.strided_load %arg7[%c1_40, %c8_41, %c0_42] {strides = array<i32: 2, 1, 1>} : memref<17x16x128xf32, #tpu.memory_space<vmem>>, vector<2x8x128xf32>
    %65 = vector.broadcast %20 : vector<1x1x128xf32> to vector<2x8x128xf32>
    %66 = arith.mulf %62, %65 : vector<2x8x128xf32>
    %67 = arith.addf %61, %66 : vector<2x8x128xf32>
    %68 = vector.broadcast %23 : vector<1x1x128xf32> to vector<2x8x128xf32>
    %69 = arith.mulf %63, %68 : vector<2x8x128xf32>
    %70 = arith.addf %67, %69 : vector<2x8x128xf32>
    %71 = vector.broadcast %26 : vector<1x1x128xf32> to vector<2x8x128xf32>
    %72 = arith.mulf %64, %71 : vector<2x8x128xf32>
    %73 = arith.addf %70, %72 : vector<2x8x128xf32>
    %c2 = arith.constant 2 : index
    %c7_43 = arith.constant 7 : index
    %c0_44 = arith.constant 0 : index
    %74 = tpu.strided_load %arg7[%c2, %c7_43, %c0_44] {strides = array<i32: 2, 1, 1>} : memref<17x16x128xf32, #tpu.memory_space<vmem>>, vector<2x8x128xf32>
    %c2_45 = arith.constant 2 : index
    %c0_46 = arith.constant 0 : index
    %c0_47 = arith.constant 0 : index
    %75 = tpu.strided_load %arg6[%c2_45, %c0_46, %c0_47] {strides = array<i32: 2, 1, 1>} : memref<17x8x128xf32, #tpu.memory_space<vmem>>, vector<2x8x128xf32>
    %c2_48 = arith.constant 2 : index
    %c8_49 = arith.constant 8 : index
    %c0_50 = arith.constant 0 : index
    %76 = tpu.strided_load %arg7[%c2_48, %c8_49, %c0_50] {strides = array<i32: 2, 1, 1>} : memref<17x16x128xf32, #tpu.memory_space<vmem>>, vector<2x8x128xf32>
    %77 = vector.broadcast %29 : vector<1x1x128xf32> to vector<2x8x128xf32>
    %78 = arith.mulf %74, %77 : vector<2x8x128xf32>
    %79 = arith.addf %73, %78 : vector<2x8x128xf32>
    %80 = vector.broadcast %32 : vector<1x1x128xf32> to vector<2x8x128xf32>
    %81 = arith.mulf %75, %80 : vector<2x8x128xf32>
    %82 = arith.addf %79, %81 : vector<2x8x128xf32>
    %83 = vector.broadcast %35 : vector<1x1x128xf32> to vector<2x8x128xf32>
    %84 = arith.mulf %76, %83 : vector<2x8x128xf32>
    %85 = arith.addf %82, %84 : vector<2x8x128xf32>
    %c0_51 = arith.constant 0 : index
    %c0_52 = arith.constant 0 : index
    %c0_53 = arith.constant 0 : index
    %c0_54 = arith.constant 0 : index
    %86 = vector.load %arg5[%c0_51, %c0_52, %c0_53, %c0_54] : memref<1x8x8x128xf32, #tpu.memory_space<vmem>>, vector<1x2x8x128xf32>
    %87 = vector.shape_cast %86 : vector<1x2x8x128xf32> to vector<2x8x128xf32>
    %88 = vector.shape_cast %85 : vector<2x8x128xf32> to vector<1x2x8x128xf32>
    tpu.vector_store %arg5[%c0_51, %c0_52, %c0_53, %c0_54], %88 {strides = array<i32>} : memref<1x8x8x128xf32, #tpu.memory_space<vmem>>, vector<1x2x8x128xf32>,
    %c0_55 = arith.constant 0 : index
    %c32 = arith.constant 32 : index
    %c0_56 = arith.constant 0 : index
    %89 = vector.load %arg1[%c0_55, %c32, %c0_56] : memref<1x128x32xf32, #tpu.memory_space<vmem>>, vector<1x32x32xf32>
    %90 = vector.shape_cast %89 : vector<1x32x32xf32> to vector<32x32xf32>
    %cst_57 = arith.constant dense<0.000000e+00> : vector<32x256xf32>
    %91 = tpu.matmul %90, %6, %cst_57 {dimension_numbers = #tpu.dot_dimension_numbers<[1], [0], [0], [1], [0, 0, 1, 1], [], []>} : vector<32x32xf32>, vector<32x256xf32>, vector<32x256xf32> -> vector<32x256xf32>
    %92 = vector.broadcast %7 : vector<1x256xf32> to vector<32x256xf32>
    %93 = arith.addf %91, %92 : vector<32x256xf32>
    %cst_58 = arith.constant 0.000000e+00 : f32
    %cst_59 = arith.constant 6.000000e+00 : f32
    %94 = vector.broadcast %cst_58 : f32 to vector<32x256xf32>
    %95 = arith.maximumf %94, %93 : vector<32x256xf32>
    %96 = vector.broadcast %cst_59 : f32 to vector<32x256xf32>
    %97 = arith.minimumf %96, %95 : vector<32x256xf32>
    %98 = vector.extract_strided_slice %97 {offsets = [0, 0], sizes = [32, 128], strides = [1, 1]} : vector<32x256xf32> to vector<32x128xf32>
    %99 = vector.shape_cast %98 : vector<32x128xf32> to vector<4x8x128xf32>
    %c5 = arith.constant 5 : index
    %c0_60 = arith.constant 0 : index
    %c0_61 = arith.constant 0 : index
    %100 = vector.load %arg6[%c5, %c0_60, %c0_61] : memref<17x8x128xf32, #tpu.memory_space<vmem>>, vector<4x8x128xf32>
    tpu.vector_store %arg6[%c5, %c0_60, %c0_61], %99 {strides = array<i32>} : memref<17x8x128xf32, #tpu.memory_space<vmem>>, vector<4x8x128xf32>,
    %101 = vector.extract_strided_slice %97 {offsets = [0, 128], sizes = [32, 128], strides = [1, 1]} : vector<32x256xf32> to vector<32x128xf32>
    %102 = vector.shape_cast %101 : vector<32x128xf32> to vector<4x8x128xf32>
    %c5_62 = arith.constant 5 : index
    %c8_63 = arith.constant 8 : index
    %c0_64 = arith.constant 0 : index
    %103 = vector.load %arg7[%c5_62, %c8_63, %c0_64] : memref<17x16x128xf32, #tpu.memory_space<vmem>>, vector<4x8x128xf32>
    tpu.vector_store %arg7[%c5_62, %c8_63, %c0_64], %102 {strides = array<i32>} : memref<17x16x128xf32, #tpu.memory_space<vmem>>, vector<4x8x128xf32>,
    %c4 = arith.constant 4 : index
    %c7_65 = arith.constant 7 : index
    %c0_66 = arith.constant 0 : index
    %104 = tpu.strided_load %arg7[%c4, %c7_65, %c0_66] {strides = array<i32: 2, 1, 1>} : memref<17x16x128xf32, #tpu.memory_space<vmem>>, vector<2x8x128xf32>
    %c4_67 = arith.constant 4 : index
    %c0_68 = arith.constant 0 : index
    %c0_69 = arith.constant 0 : index
    %105 = tpu.strided_load %arg6[%c4_67, %c0_68, %c0_69] {strides = array<i32: 2, 1, 1>} : memref<17x8x128xf32, #tpu.memory_space<vmem>>, vector<2x8x128xf32>
    %c4_70 = arith.constant 4 : index
    %c8_71 = arith.constant 8 : index
    %c0_72 = arith.constant 0 : index
    %106 = tpu.strided_load %arg7[%c4_70, %c8_71, %c0_72] {strides = array<i32: 2, 1, 1>} : memref<17x16x128xf32, #tpu.memory_space<vmem>>, vector<2x8x128xf32>
    %107 = vector.broadcast %11 : vector<1x1x128xf32> to vector<2x8x128xf32>
    %108 = arith.mulf %104, %107 : vector<2x8x128xf32>
    %109 = vector.broadcast %14 : vector<1x1x128xf32> to vector<2x8x128xf32>
    %110 = arith.mulf %105, %109 : vector<2x8x128xf32>
    %111 = arith.addf %108, %110 : vector<2x8x128xf32>
    %112 = vector.broadcast %17 : vector<1x1x128xf32> to vector<2x8x128xf32>
    %113 = arith.mulf %106, %112 : vector<2x8x128xf32>
    %114 = arith.addf %111, %113 : vector<2x8x128xf32>
    %c5_73 = arith.constant 5 : index
    %c7_74 = arith.constant 7 : index
    %c0_75 = arith.constant 0 : index
    %115 = tpu.strided_load %arg7[%c5_73, %c7_74, %c0_75] {strides = array<i32: 2, 1, 1>} : memref<17x16x128xf32, #tpu.memory_space<vmem>>, vector<2x8x128xf32>
    %c5_76 = arith.constant 5 : index
    %c0_77 = arith.constant 0 : index
    %c0_78 = arith.constant 0 : index
    %116 = tpu.strided_load %arg6[%c5_76, %c0_77, %c0_78] {strides = array<i32: 2, 1, 1>} : memref<17x8x128xf32, #tpu.memory_space<vmem>>, vector<2x8x128xf32>
    %c5_79 = arith.constant 5 : index
    %c8_80 = arith.constant 8 : index
    %c0_81 = arith.constant 0 : index
    %117 = tpu.strided_load %arg7[%c5_79, %c8_80, %c0_81] {strides = array<i32: 2, 1, 1>} : memref<17x16x128xf32, #tpu.memory_space<vmem>>, vector<2x8x128xf32>
    %118 = vector.broadcast %20 : vector<1x1x128xf32> to vector<2x8x128xf32>
    %119 = arith.mulf %115, %118 : vector<2x8x128xf32>
    %120 = arith.addf %114, %119 : vector<2x8x128xf32>
    %121 = vector.broadcast %23 : vector<1x1x128xf32> to vector<2x8x128xf32>
    %122 = arith.mulf %116, %121 : vector<2x8x128xf32>
    %123 = arith.addf %120, %122 : vector<2x8x128xf32>
    %124 = vector.broadcast %26 : vector<1x1x128xf32> to vector<2x8x128xf32>
    %125 = arith.mulf %117, %124 : vector<2x8x128xf32>
    %126 = arith.addf %123, %125 : vector<2x8x128xf32>
    %c6 = arith.constant 6 : index
    %c7_82 = arith.constant 7 : index
    %c0_83 = arith.constant 0 : index
    %127 = tpu.strided_load %arg7[%c6, %c7_82, %c0_83] {strides = array<i32: 2, 1, 1>} : memref<17x16x128xf32, #tpu.memory_space<vmem>>, vector<2x8x128xf32>
    %c6_84 = arith.constant 6 : index
    %c0_85 = arith.constant 0 : index
    %c0_86 = arith.constant 0 : index
    %128 = tpu.strided_load %arg6[%c6_84, %c0_85, %c0_86] {strides = array<i32: 2, 1, 1>} : memref<17x8x128xf32, #tpu.memory_space<vmem>>, vector<2x8x128xf32>
    %c6_87 = arith.constant 6 : index
    %c8_88 = arith.constant 8 : index
    %c0_89 = arith.constant 0 : index
    %129 = tpu.strided_load %arg7[%c6_87, %c8_88, %c0_89] {strides = array<i32: 2, 1, 1>} : memref<17x16x128xf32, #tpu.memory_space<vmem>>, vector<2x8x128xf32>
    %130 = vector.broadcast %29 : vector<1x1x128xf32> to vector<2x8x128xf32>
    %131 = arith.mulf %127, %130 : vector<2x8x128xf32>
    %132 = arith.addf %126, %131 : vector<2x8x128xf32>
    %133 = vector.broadcast %32 : vector<1x1x128xf32> to vector<2x8x128xf32>
    %134 = arith.mulf %128, %133 : vector<2x8x128xf32>
    %135 = arith.addf %132, %134 : vector<2x8x128xf32>
    %136 = vector.broadcast %35 : vector<1x1x128xf32> to vector<2x8x128xf32>
    %137 = arith.mulf %129, %136 : vector<2x8x128xf32>
    %138 = arith.addf %135, %137 : vector<2x8x128xf32>
    %c0_90 = arith.constant 0 : index
    %c2_91 = arith.constant 2 : index
    %c0_92 = arith.constant 0 : index
    %c0_93 = arith.constant 0 : index
    %139 = vector.load %arg5[%c0_90, %c2_91, %c0_92, %c0_93] : memref<1x8x8x128xf32, #tpu.memory_space<vmem>>, vector<1x2x8x128xf32>
    %140 = vector.shape_cast %139 : vector<1x2x8x128xf32> to vector<2x8x128xf32>
    %141 = vector.shape_cast %138 : vector<2x8x128xf32> to vector<1x2x8x128xf32>
    tpu.vector_store %arg5[%c0_90, %c2_91, %c0_92, %c0_93], %141 {strides = array<i32>} : memref<1x8x8x128xf32, #tpu.memory_space<vmem>>, vector<1x2x8x128xf32>,
    %c0_94 = arith.constant 0 : index
    %c64 = arith.constant 64 : index
    %c0_95 = arith.constant 0 : index
    %142 = vector.load %arg1[%c0_94, %c64, %c0_95] : memref<1x128x32xf32, #tpu.memory_space<vmem>>, vector<1x32x32xf32>
    %143 = vector.shape_cast %142 : vector<1x32x32xf32> to vector<32x32xf32>
    %cst_96 = arith.constant dense<0.000000e+00> : vector<32x256xf32>
    %144 = tpu.matmul %143, %6, %cst_96 {dimension_numbers = #tpu.dot_dimension_numbers<[1], [0], [0], [1], [0, 0, 1, 1], [], []>} : vector<32x32xf32>, vector<32x256xf32>, vector<32x256xf32> -> vector<32x256xf32>
    %145 = vector.broadcast %7 : vector<1x256xf32> to vector<32x256xf32>
    %146 = arith.addf %144, %145 : vector<32x256xf32>
    %cst_97 = arith.constant 0.000000e+00 : f32
    %cst_98 = arith.constant 6.000000e+00 : f32
    %147 = vector.broadcast %cst_97 : f32 to vector<32x256xf32>
    %148 = arith.maximumf %147, %146 : vector<32x256xf32>
    %149 = vector.broadcast %cst_98 : f32 to vector<32x256xf32>
    %150 = arith.minimumf %149, %148 : vector<32x256xf32>
    %151 = vector.extract_strided_slice %150 {offsets = [0, 0], sizes = [32, 128], strides = [1, 1]} : vector<32x256xf32> to vector<32x128xf32>
    %152 = vector.shape_cast %151 : vector<32x128xf32> to vector<4x8x128xf32>
    %c9 = arith.constant 9 : index
    %c0_99 = arith.constant 0 : index
    %c0_100 = arith.constant 0 : index
    %153 = vector.load %arg6[%c9, %c0_99, %c0_100] : memref<17x8x128xf32, #tpu.memory_space<vmem>>, vector<4x8x128xf32>
    tpu.vector_store %arg6[%c9, %c0_99, %c0_100], %152 {strides = array<i32>} : memref<17x8x128xf32, #tpu.memory_space<vmem>>, vector<4x8x128xf32>,
    %154 = vector.extract_strided_slice %150 {offsets = [0, 128], sizes = [32, 128], strides = [1, 1]} : vector<32x256xf32> to vector<32x128xf32>
    %155 = vector.shape_cast %154 : vector<32x128xf32> to vector<4x8x128xf32>
    %c9_101 = arith.constant 9 : index
    %c8_102 = arith.constant 8 : index
    %c0_103 = arith.constant 0 : index
    %156 = vector.load %arg7[%c9_101, %c8_102, %c0_103] : memref<17x16x128xf32, #tpu.memory_space<vmem>>, vector<4x8x128xf32>
    tpu.vector_store %arg7[%c9_101, %c8_102, %c0_103], %155 {strides = array<i32>} : memref<17x16x128xf32, #tpu.memory_space<vmem>>, vector<4x8x128xf32>,
    %c8_104 = arith.constant 8 : index
    %c7_105 = arith.constant 7 : index
    %c0_106 = arith.constant 0 : index
    %157 = tpu.strided_load %arg7[%c8_104, %c7_105, %c0_106] {strides = array<i32: 2, 1, 1>} : memref<17x16x128xf32, #tpu.memory_space<vmem>>, vector<2x8x128xf32>
    %c8_107 = arith.constant 8 : index
    %c0_108 = arith.constant 0 : index
    %c0_109 = arith.constant 0 : index
    %158 = tpu.strided_load %arg6[%c8_107, %c0_108, %c0_109] {strides = array<i32: 2, 1, 1>} : memref<17x8x128xf32, #tpu.memory_space<vmem>>, vector<2x8x128xf32>
    %c8_110 = arith.constant 8 : index
    %c8_111 = arith.constant 8 : index
    %c0_112 = arith.constant 0 : index
    %159 = tpu.strided_load %arg7[%c8_110, %c8_111, %c0_112] {strides = array<i32: 2, 1, 1>} : memref<17x16x128xf32, #tpu.memory_space<vmem>>, vector<2x8x128xf32>
    %160 = vector.broadcast %11 : vector<1x1x128xf32> to vector<2x8x128xf32>
    %161 = arith.mulf %157, %160 : vector<2x8x128xf32>
    %162 = vector.broadcast %14 : vector<1x1x128xf32> to vector<2x8x128xf32>
    %163 = arith.mulf %158, %162 : vector<2x8x128xf32>
    %164 = arith.addf %161, %163 : vector<2x8x128xf32>
    %165 = vector.broadcast %17 : vector<1x1x128xf32> to vector<2x8x128xf32>
    %166 = arith.mulf %159, %165 : vector<2x8x128xf32>
    %167 = arith.addf %164, %166 : vector<2x8x128xf32>
    %c9_113 = arith.constant 9 : index
    %c7_114 = arith.constant 7 : index
    %c0_115 = arith.constant 0 : index
    %168 = tpu.strided_load %arg7[%c9_113, %c7_114, %c0_115] {strides = array<i32: 2, 1, 1>} : memref<17x16x128xf32, #tpu.memory_space<vmem>>, vector<2x8x128xf32>
    %c9_116 = arith.constant 9 : index
    %c0_117 = arith.constant 0 : index
    %c0_118 = arith.constant 0 : index
    %169 = tpu.strided_load %arg6[%c9_116, %c0_117, %c0_118] {strides = array<i32: 2, 1, 1>} : memref<17x8x128xf32, #tpu.memory_space<vmem>>, vector<2x8x128xf32>
    %c9_119 = arith.constant 9 : index
    %c8_120 = arith.constant 8 : index
    %c0_121 = arith.constant 0 : index
    %170 = tpu.strided_load %arg7[%c9_119, %c8_120, %c0_121] {strides = array<i32: 2, 1, 1>} : memref<17x16x128xf32, #tpu.memory_space<vmem>>, vector<2x8x128xf32>
    %171 = vector.broadcast %20 : vector<1x1x128xf32> to vector<2x8x128xf32>
    %172 = arith.mulf %168, %171 : vector<2x8x128xf32>
    %173 = arith.addf %167, %172 : vector<2x8x128xf32>
    %174 = vector.broadcast %23 : vector<1x1x128xf32> to vector<2x8x128xf32>
    %175 = arith.mulf %169, %174 : vector<2x8x128xf32>
    %176 = arith.addf %173, %175 : vector<2x8x128xf32>
    %177 = vector.broadcast %26 : vector<1x1x128xf32> to vector<2x8x128xf32>
    %178 = arith.mulf %170, %177 : vector<2x8x128xf32>
    %179 = arith.addf %176, %178 : vector<2x8x128xf32>
    %c10 = arith.constant 10 : index
    %c7_122 = arith.constant 7 : index
    %c0_123 = arith.constant 0 : index
    %180 = tpu.strided_load %arg7[%c10, %c7_122, %c0_123] {strides = array<i32: 2, 1, 1>} : memref<17x16x128xf32, #tpu.memory_space<vmem>>, vector<2x8x128xf32>
    %c10_124 = arith.constant 10 : index
    %c0_125 = arith.constant 0 : index
    %c0_126 = arith.constant 0 : index
    %181 = tpu.strided_load %arg6[%c10_124, %c0_125, %c0_126] {strides = array<i32: 2, 1, 1>} : memref<17x8x128xf32, #tpu.memory_space<vmem>>, vector<2x8x128xf32>
    %c10_127 = arith.constant 10 : index
    %c8_128 = arith.constant 8 : index
    %c0_129 = arith.constant 0 : index
    %182 = tpu.strided_load %arg7[%c10_127, %c8_128, %c0_129] {strides = array<i32: 2, 1, 1>} : memref<17x16x128xf32, #tpu.memory_space<vmem>>, vector<2x8x128xf32>
    %183 = vector.broadcast %29 : vector<1x1x128xf32> to vector<2x8x128xf32>
    %184 = arith.mulf %180, %183 : vector<2x8x128xf32>
    %185 = arith.addf %179, %184 : vector<2x8x128xf32>
    %186 = vector.broadcast %32 : vector<1x1x128xf32> to vector<2x8x128xf32>
    %187 = arith.mulf %181, %186 : vector<2x8x128xf32>
    %188 = arith.addf %185, %187 : vector<2x8x128xf32>
    %189 = vector.broadcast %35 : vector<1x1x128xf32> to vector<2x8x128xf32>
    %190 = arith.mulf %182, %189 : vector<2x8x128xf32>
    %191 = arith.addf %188, %190 : vector<2x8x128xf32>
    %c0_130 = arith.constant 0 : index
    %c4_131 = arith.constant 4 : index
    %c0_132 = arith.constant 0 : index
    %c0_133 = arith.constant 0 : index
    %192 = vector.load %arg5[%c0_130, %c4_131, %c0_132, %c0_133] : memref<1x8x8x128xf32, #tpu.memory_space<vmem>>, vector<1x2x8x128xf32>
    %193 = vector.shape_cast %192 : vector<1x2x8x128xf32> to vector<2x8x128xf32>
    %194 = vector.shape_cast %191 : vector<2x8x128xf32> to vector<1x2x8x128xf32>
    tpu.vector_store %arg5[%c0_130, %c4_131, %c0_132, %c0_133], %194 {strides = array<i32>} : memref<1x8x8x128xf32, #tpu.memory_space<vmem>>, vector<1x2x8x128xf32>,
    %c0_134 = arith.constant 0 : index
    %c96 = arith.constant 96 : index
    %c0_135 = arith.constant 0 : index
    %195 = vector.load %arg1[%c0_134, %c96, %c0_135] : memref<1x128x32xf32, #tpu.memory_space<vmem>>, vector<1x32x32xf32>
    %196 = vector.shape_cast %195 : vector<1x32x32xf32> to vector<32x32xf32>
    %cst_136 = arith.constant dense<0.000000e+00> : vector<32x256xf32>
    %197 = tpu.matmul %196, %6, %cst_136 {dimension_numbers = #tpu.dot_dimension_numbers<[1], [0], [0], [1], [0, 0, 1, 1], [], []>} : vector<32x32xf32>, vector<32x256xf32>, vector<32x256xf32> -> vector<32x256xf32>
    %198 = vector.broadcast %7 : vector<1x256xf32> to vector<32x256xf32>
    %199 = arith.addf %197, %198 : vector<32x256xf32>
    %cst_137 = arith.constant 0.000000e+00 : f32
    %cst_138 = arith.constant 6.000000e+00 : f32
    %200 = vector.broadcast %cst_137 : f32 to vector<32x256xf32>
    %201 = arith.maximumf %200, %199 : vector<32x256xf32>
    %202 = vector.broadcast %cst_138 : f32 to vector<32x256xf32>
    %203 = arith.minimumf %202, %201 : vector<32x256xf32>
    %204 = vector.extract_strided_slice %203 {offsets = [0, 0], sizes = [32, 128], strides = [1, 1]} : vector<32x256xf32> to vector<32x128xf32>
    %205 = vector.shape_cast %204 : vector<32x128xf32> to vector<4x8x128xf32>
    %c13 = arith.constant 13 : index
    %c0_139 = arith.constant 0 : index
    %c0_140 = arith.constant 0 : index
    %206 = vector.load %arg6[%c13, %c0_139, %c0_140] : memref<17x8x128xf32, #tpu.memory_space<vmem>>, vector<4x8x128xf32>
    tpu.vector_store %arg6[%c13, %c0_139, %c0_140], %205 {strides = array<i32>} : memref<17x8x128xf32, #tpu.memory_space<vmem>>, vector<4x8x128xf32>,
    %207 = vector.extract_strided_slice %203 {offsets = [0, 128], sizes = [32, 128], strides = [1, 1]} : vector<32x256xf32> to vector<32x128xf32>
    %208 = vector.shape_cast %207 : vector<32x128xf32> to vector<4x8x128xf32>
    %c13_141 = arith.constant 13 : index
    %c8_142 = arith.constant 8 : index
    %c0_143 = arith.constant 0 : index
    %209 = vector.load %arg7[%c13_141, %c8_142, %c0_143] : memref<17x16x128xf32, #tpu.memory_space<vmem>>, vector<4x8x128xf32>
    tpu.vector_store %arg7[%c13_141, %c8_142, %c0_143], %208 {strides = array<i32>} : memref<17x16x128xf32, #tpu.memory_space<vmem>>, vector<4x8x128xf32>,
    %c12 = arith.constant 12 : index
    %c7_144 = arith.constant 7 : index
    %c0_145 = arith.constant 0 : index
    %210 = tpu.strided_load %arg7[%c12, %c7_144, %c0_145] {strides = array<i32: 2, 1, 1>} : memref<17x16x128xf32, #tpu.memory_space<vmem>>, vector<2x8x128xf32>
    %c12_146 = arith.constant 12 : index
    %c0_147 = arith.constant 0 : index
    %c0_148 = arith.constant 0 : index
    %211 = tpu.strided_load %arg6[%c12_146, %c0_147, %c0_148] {strides = array<i32: 2, 1, 1>} : memref<17x8x128xf32, #tpu.memory_space<vmem>>, vector<2x8x128xf32>
    %c12_149 = arith.constant 12 : index
    %c8_150 = arith.constant 8 : index
    %c0_151 = arith.constant 0 : index
    %212 = tpu.strided_load %arg7[%c12_149, %c8_150, %c0_151] {strides = array<i32: 2, 1, 1>} : memref<17x16x128xf32, #tpu.memory_space<vmem>>, vector<2x8x128xf32>
    %213 = vector.broadcast %11 : vector<1x1x128xf32> to vector<2x8x128xf32>
    %214 = arith.mulf %210, %213 : vector<2x8x128xf32>
    %215 = vector.broadcast %14 : vector<1x1x128xf32> to vector<2x8x128xf32>
    %216 = arith.mulf %211, %215 : vector<2x8x128xf32>
    %217 = arith.addf %214, %216 : vector<2x8x128xf32>
    %218 = vector.broadcast %17 : vector<1x1x128xf32> to vector<2x8x128xf32>
    %219 = arith.mulf %212, %218 : vector<2x8x128xf32>
    %220 = arith.addf %217, %219 : vector<2x8x128xf32>
    %c13_152 = arith.constant 13 : index
    %c7_153 = arith.constant 7 : index
    %c0_154 = arith.constant 0 : index
    %221 = tpu.strided_load %arg7[%c13_152, %c7_153, %c0_154] {strides = array<i32: 2, 1, 1>} : memref<17x16x128xf32, #tpu.memory_space<vmem>>, vector<2x8x128xf32>
    %c13_155 = arith.constant 13 : index
    %c0_156 = arith.constant 0 : index
    %c0_157 = arith.constant 0 : index
    %222 = tpu.strided_load %arg6[%c13_155, %c0_156, %c0_157] {strides = array<i32: 2, 1, 1>} : memref<17x8x128xf32, #tpu.memory_space<vmem>>, vector<2x8x128xf32>
    %c13_158 = arith.constant 13 : index
    %c8_159 = arith.constant 8 : index
    %c0_160 = arith.constant 0 : index
    %223 = tpu.strided_load %arg7[%c13_158, %c8_159, %c0_160] {strides = array<i32: 2, 1, 1>} : memref<17x16x128xf32, #tpu.memory_space<vmem>>, vector<2x8x128xf32>
    %224 = vector.broadcast %20 : vector<1x1x128xf32> to vector<2x8x128xf32>
    %225 = arith.mulf %221, %224 : vector<2x8x128xf32>
    %226 = arith.addf %220, %225 : vector<2x8x128xf32>
    %227 = vector.broadcast %23 : vector<1x1x128xf32> to vector<2x8x128xf32>
    %228 = arith.mulf %222, %227 : vector<2x8x128xf32>
    %229 = arith.addf %226, %228 : vector<2x8x128xf32>
    %230 = vector.broadcast %26 : vector<1x1x128xf32> to vector<2x8x128xf32>
    %231 = arith.mulf %223, %230 : vector<2x8x128xf32>
    %232 = arith.addf %229, %231 : vector<2x8x128xf32>
    %c14 = arith.constant 14 : index
    %c7_161 = arith.constant 7 : index
    %c0_162 = arith.constant 0 : index
    %233 = tpu.strided_load %arg7[%c14, %c7_161, %c0_162] {strides = array<i32: 2, 1, 1>} : memref<17x16x128xf32, #tpu.memory_space<vmem>>, vector<2x8x128xf32>
    %c14_163 = arith.constant 14 : index
    %c0_164 = arith.constant 0 : index
    %c0_165 = arith.constant 0 : index
    %234 = tpu.strided_load %arg6[%c14_163, %c0_164, %c0_165] {strides = array<i32: 2, 1, 1>} : memref<17x8x128xf32, #tpu.memory_space<vmem>>, vector<2x8x128xf32>
    %c14_166 = arith.constant 14 : index
    %c8_167 = arith.constant 8 : index
    %c0_168 = arith.constant 0 : index
    %235 = tpu.strided_load %arg7[%c14_166, %c8_167, %c0_168] {strides = array<i32: 2, 1, 1>} : memref<17x16x128xf32, #tpu.memory_space<vmem>>, vector<2x8x128xf32>
    %236 = vector.broadcast %29 : vector<1x1x128xf32> to vector<2x8x128xf32>
    %237 = arith.mulf %233, %236 : vector<2x8x128xf32>
    %238 = arith.addf %232, %237 : vector<2x8x128xf32>
    %239 = vector.broadcast %32 : vector<1x1x128xf32> to vector<2x8x128xf32>
    %240 = arith.mulf %234, %239 : vector<2x8x128xf32>
    %241 = arith.addf %238, %240 : vector<2x8x128xf32>
    %242 = vector.broadcast %35 : vector<1x1x128xf32> to vector<2x8x128xf32>
    %243 = arith.mulf %235, %242 : vector<2x8x128xf32>
    %244 = arith.addf %241, %243 : vector<2x8x128xf32>
    %c0_169 = arith.constant 0 : index
    %c6_170 = arith.constant 6 : index
    %c0_171 = arith.constant 0 : index
    %c0_172 = arith.constant 0 : index
    %245 = vector.load %arg5[%c0_169, %c6_170, %c0_171, %c0_172] : memref<1x8x8x128xf32, #tpu.memory_space<vmem>>, vector<1x2x8x128xf32>
    %246 = vector.shape_cast %245 : vector<1x2x8x128xf32> to vector<2x8x128xf32>
    %247 = vector.shape_cast %244 : vector<2x8x128xf32> to vector<1x2x8x128xf32>
    tpu.vector_store %arg5[%c0_169, %c6_170, %c0_171, %c0_172], %247 {strides = array<i32>} : memref<1x8x8x128xf32, #tpu.memory_space<vmem>>, vector<1x2x8x128xf32>,
    return
  }
  func.func @transform_0(%arg0: i32) -> (i32, i32, i32) {
    %c0_i32 = arith.constant 0 : i32
    %c0_i32_0 = arith.constant 0 : i32
    %c0_i32_1 = arith.constant 0 : i32
    return %arg0, %c0_i32, %c0_i32_0 : i32, i32, i32
  }
  func.func @transform_1(%arg0: i32) -> (i32, i32) {
    %c0_i32 = arith.constant 0 : i32
    %c0_i32_0 = arith.constant 0 : i32
    %c0_i32_1 = arith.constant 0 : i32
    return %c0_i32, %c0_i32_0 : i32, i32
  }
  func.func @transform_2(%arg0: i32) -> (i32, i32) {
    %c0_i32 = arith.constant 0 : i32
    %c0_i32_0 = arith.constant 0 : i32
    %c0_i32_1 = arith.constant 0 : i32
    return %c0_i32, %c0_i32_0 : i32, i32
  }
  func.func @transform_3(%arg0: i32) -> (i32, i32) {
    %c0_i32 = arith.constant 0 : i32
    %c0_i32_0 = arith.constant 0 : i32
    %c0_i32_1 = arith.constant 0 : i32
    return %c0_i32, %c0_i32_0 : i32, i32
  }
  func.func @transform_4(%arg0: i32) -> (i32, i32, i32, i32) {
    %c0_i32 = arith.constant 0 : i32
    %c0_i32_0 = arith.constant 0 : i32
    %c0_i32_1 = arith.constant 0 : i32
    %c0_i32_2 = arith.constant 0 : i32
    return %arg0, %c0_i32, %c0_i32_0, %c0_i32_1 : i32, i32, i32, i32
  }
}

</mosaic_0001>

<bundles_post_ra>
// kernel: model_forward.1
= control target key start
LH: loop header
LB: loop body
LE: loop exit
PB: predicated region body
PF: predicated region fallthrough
CT: control target
= control target key end

     0   :  { %s1200_s15 = smov 0   ;;  %s1588_s0 = inlined_call_operand.vmem [shape: f32[2,128,32], index: 0, kind: input, shape index: {}]   ;;  %s1589_s1 = inlined_call_operand.vmem [shape: f32[32,256], index: 1, kind: input, shape index: {}]   ;;  %s1590_s2 = inlined_call_operand.vmem [shape: f32[1,256], index: 2, kind: input, shape index: {}]   ;;  %s1591_s3 = inlined_call_operand.vmem [shape: f32[9,128], index: 3, kind: input, shape index: {}]   ;;  %s1592_s4 = inlined_call_operand.vmem [shape: f32[2,8,8,128], index: 4, kind: output, shape index: {}]  }
   0x1 LB: > { %s1089_s16 = sadd.s32 4294967295, %s1172_s15   ;;  %p1093_p0 = scmp.ge.s32.totalorder %s1172_s15, 1  ;;  %s1172_s15 = sphi %s1200_s15, %s14_s15  }
   0x2   : > { %p162_p1 = scmp.lt.s32.totalorder %s1172_s15, 3 }
   0x4   : > { %p163_p2 = pnand %p1093_p0, %p162_p1 }
   0x5   : > { %v219_v0 = vld [vmem:[%s1589_s1 + $0x8] sm:$0xff] (!%p163_p2)  ;;  %v221_v1 = vld [vmem:[%s1589_s1 + $0x18] sm:$0xff] (!%p163_p2)  ;;  %v218_v2 = vld [vmem:[%s1589_s1] sm:$0xff] (!%p163_p2)  ;;  %p1219_p3 = scmp.lt.s32.totalorder (!%p163_p2), %s1089_s16, 1  ;;  %v1174_v7 = vmov (!%p163_p2), 0.0   ;;  %vm244_vm0 = vcmask (!%p163_p2), 261120   ;;  %v234_v29 = vlaneseq (!%p163_p2) }
   0x6   : > { %166 = sbr.rel (%p163_p2) target bundleno = 303 (0x12f), region = 36  ;;  %v1125_v3 = vpack.c.bf16 (!%p163_p2), %v221_v1, %v219_v0  ;;  %v220_v4 = vld [vmem:[%s1589_s1 + $0x10] sm:$0xff] (!%p163_p2)  ;;  %v223_v5 = vld [vmem:[%s1589_s1 + $0x28] sm:$0xff] (!%p163_p2)  ;;  %v225_v6 = vld [vmem:[%s1589_s1 + $0x38] sm:$0xff] (!%p163_p2)  ;;  %321 = vmatprep.mubr.f32.mxu0 (!%p163_p2), %v1174_v7  ;;  %200 = vst [vmem:[#allocation3 + $0x8] sm:$0xff] (!%p163_p2), %v1174_v7  ;;  %544 = vmatprep.mubr.f32.mxu1 (!%p163_p2), %v1174_v7 }
   0x7   : > { %202 = vst [vmem:[#allocation3 + $0x10] sm:$0xff] (!%p163_p2), %v1174_v7  ;;  %203 = vst [vmem:[#allocation3 + $0x20] sm:$0xff] (!%p163_p2), %v1174_v7  ;;  %v1127_v8 = vpack.c.bf16 (!%p163_p2), %v220_v4, %v218_v2  ;;  %v1129_v9 = vpack.c.bf16 (!%p163_p2), %v225_v6, %v223_v5  ;;  %v222_v10 = vld [vmem:[%s1589_s1 + $0x20] sm:$0xff] (!%p163_p2)  ;;  %v224_v11 = vld [vmem:[%s1589_s1 + $0x30] sm:$0xff] (!%p163_p2)  ;;  %v1316_v30 = vshrl.u32 (!%p163_p2), %v234_v29, 7 }
   0x8   : > { %204 = vst [vmem:[#allocation3 + $0x30] sm:$0xff] (!%p163_p2), %v1174_v7  ;;  %205 = vst [vmem:[#allocation3 + $0x40] sm:$0xff] (!%p163_p2), %v1174_v7  ;;  %1126 = vmatprep.subr.bf16.mxu0 (!%p163_p2), %v1125_v3  ;;  %1134 = vmatprep.subr.bf16.mxu1 (!%p163_p2), %v1125_v3  ;;  %v1131_v12 = vpack.c.bf16 (!%p163_p2), %v224_v11, %v222_v10  ;;  %v226_v32 = vld [vmem:[%s1590_s2] sm:$0x3] (!%p163_p2) }
   0x9   : > { %206 = vst [vmem:[#allocation3 + $0x50] sm:$0xff] (!%p163_p2), %v1174_v7  ;;  %207 = vst [vmem:[#allocation3 + $0x60] sm:$0xff] (!%p163_p2), %v1174_v7  ;;  %1128 = vmatpush1.bf16.msra.mxu0 (!%p163_p2), %v1127_v8  ;;  %1136 = vmatpush1.bf16.msra.mxu1 (!%p163_p2), %v1127_v8  ;;  %v240_v31 = vsub.s32 (!%p163_p2), 1, %v1316_v30  ;;  %v236_v33 = vsub.s32 (!%p163_p2), 0, %v1316_v30  ;;  %v1328_v35 = vld [vmem:[%s1591_s3] sm:$0xff] (!%p163_p2)  ;;  %v394_v46 = vsub.s32 (!%p163_p2), 2, %v1316_v30 }
   0xa   : > { %208 = vst [vmem:[#allocation3 + $0x70] sm:$0xff] (!%p163_p2), %v1174_v7  ;;  %209 = vst [vmem:[#allocation3 + $0x80] sm:$0xff] (!%p163_p2), %v1174_v7  ;;  %1130 = vmatprep.subr.bf16.mxu0 (!%p163_p2), %v1129_v9  ;;  %1138 = vmatprep.subr.bf16.mxu1 (!%p163_p2), %v1129_v9  ;;  %v416_v48 = vsub.s32 (!%p163_p2), 4, %v1316_v30  ;;  %v408_v63 = vsub.s32 (!%p163_p2), 3, %v1316_v30  ;;  %v424_v0 = vsub.s32 (!%p163_p2), 5, %v1316_v30  ;;  %v448_v1 = vsub.s32 (!%p163_p2), 7, %v1316_v30 }
   0xb   : > { %210 = vst [vmem:[#allocation3 + $0x90] sm:$0xff] (!%p163_p2), %v1174_v7  ;;  %211 = vst [vmem:[#allocation3 + $0xa0] sm:$0xff] (!%p163_p2), %v1174_v7  ;;  %v1323_v34 = vrot.slane (!%p163_p2), %v226_v32, %v240_v31  ;;  %v1330_v36 = vrot.slane (!%p163_p2), %v226_v32, %v236_v33  ;;  %v1333_v41 = vrot.slane (!%p163_p2), %v1328_v35, %v240_v31 }
   0xc   : > { %212 = vst [vmem:[#allocation3 + $0xb0] sm:$0xff] (!%p163_p2), %v1174_v7  ;;  %213 = vst [vmem:[#allocation3 + $0xc0] sm:$0xff] (!%p163_p2), %v1174_v7  ;;  %v1336_v42 = vrot.slane (!%p163_p2), %v1328_v35, %v236_v33  ;;  %v1357_v2 = vrot.slane (!%p163_p2), %v1328_v35, %v394_v46 }
   0xd   : > { %214 = vst [vmem:[#allocation3 + $0xd0] sm:$0xff] %v1174_v7  ;;  %215 = vst [vmem:[#allocation3 + $0xe0] sm:$0xff] %v1174_v7  ;;  %s1595_s16 = smov (!%p1219_p3, %s1089_s16), 1  ;;  %1132 = vmatpush1.bf16.msra.mxu0 %v1131_v12  ;;  %1140 = vmatpush1.bf16.msra.mxu1 %v1131_v12  ;;  %v388_v57 = vmul.f32 0.0, %v1333_v41 }
   0xe   : > { %216 = vst [vmem:[#allocation3 + $0xf0] sm:$0xff] %v1174_v7  ;;  %217 = vst [vmem:[#allocation3 + $0x100] sm:$0xff] %v1174_v7  ;;  %s1123_s8 = sshll.u32 %s1595_s16, 7  ;;  %1142 = vmatprep.subr.bf16.mxu0 %v1125_v3  ;;  %1150 = vmatprep.subr.bf16.mxu1 %v1125_v3  ;;  %s1124_s20 = sshll.u32 %s1595_s16, 6 }
   0xf   : > { %201 = vst [vmem:[#allocation3] sm:$0xff] %v1174_v7  ;;  %s1268_s11 = scalar_lea.vmem %s1588_s0, %s1123_s8  ;;  %s1458_s22 = scalar_lea.vmem %s1592_s4, %s1124_s20 }
  0x10   : > { %v229_v13 = vld [vmem:[%s1268_s11] sm:$0xff]  ;;  %v230_v15 = vld [vmem:[%s1268_s11 + $0x8] sm:$0xff]  ;;  %v231_v17 = vld [vmem:[%s1268_s11 + $0x10] sm:$0xff] }
  0x11   : > { %v464_v14 = vld [vmem:[%s1268_s11 + $0x20] sm:$0xff]  ;;  %1098 = vmatmul.mubr.msk.f32.vlgmr.msra.gmra.mrb[0].mxu0 %vm244_vm0, %v229_v13  ;;  %v465_v16 = vld [vmem:[%s1268_s11 + $0x28] sm:$0xff]  ;;  %v466_v18 = vld [vmem:[%s1268_s11 + $0x30] sm:$0xff] }
  0x12   : > { %1103 = vmatmul.mubr.msk.f32.vlgmr.msra.gmra.mrb[0].mxu1 %vm244_vm0, %v464_v14  ;;  %1144 = vmatpush1.bf16.msra.mxu0 %v1127_v8  ;;  %v232_v19 = vld [vmem:[%s1268_s11 + $0x18] sm:$0xff]  ;;  %v654_v21 = vld [vmem:[%s1268_s11 + $0x40] sm:$0xff]  ;;  %v655_v23 = vld [vmem:[%s1268_s11 + $0x48] sm:$0xff] }
  0x13   : > { %327 = vmatprep.mubr.f32.mxu0 %v1174_v7  ;;  %550 = vmatprep.mubr.f32.mxu1 %v1174_v7  ;;  %v467_v20 = vld [vmem:[%s1268_s11 + $0x38] sm:$0xff]  ;;  %v844_v22 = vld [vmem:[%s1268_s11 + $0x60] sm:$0xff]  ;;  %v845_v24 = vld [vmem:[%s1268_s11 + $0x68] sm:$0xff] }
  0x14   : > { %1146 = vmatprep.subr.bf16.mxu0 %v1129_v9  ;;  %1152 = vmatpush1.bf16.msra.mxu1 %v1127_v8  ;;  %v656_v25 = vld [vmem:[%s1268_s11 + $0x50] sm:$0xff]  ;;  %v657_v27 = vld [vmem:[%s1268_s11 + $0x58] sm:$0xff] }
  0x15   : > { %1099 = vmatmul.mubr.msk.f32.gmra.mrb[2].mxu0 %vm244_vm0, %v230_v15  ;;  %1154 = vmatprep.subr.bf16.mxu1 %v1129_v9  ;;  %v846_v26 = vld [vmem:[%s1268_s11 + $0x70] sm:$0xff]  ;;  %v847_v28 = vld [vmem:[%s1268_s11 + $0x78] sm:$0xff] }
  0x16   : > { %1104 = vmatmul.mubr.msk.f32.gmra.mrb[2].mxu1 %vm244_vm0, %v465_v16  ;;  %333 = vmatprep.mubr.f32.mxu0 %v1174_v7  ;;  %v372_v45 = vld [vmem:[#allocation3 + $0x7] sm:$0xff] }
  0x17   : > { %556 = vmatprep.mubr.f32.mxu1 %v1174_v7  ;;  %1148 = vmatpush1.bf16.msra.mxu0 %v1131_v12  ;;  %v382_v56 = vmul.f32 %v1336_v42, %v372_v45 }
  0x18   : > { %1156 = vmatpush1.bf16.msra.mxu1 %v1131_v12  ;;  %v396_v12 = vmul.f32 0.0, %v1357_v2 }
  0x19   : > { %1100 = vmatmul.mubr.msk.f32.gmra.mrb[4].mxu0 %vm244_vm0, %v231_v17  ;;  %v390_v11 = vadd.f32 %v388_v57, %v382_v56 }
  0x1a   : > { %1105 = vmatmul.mubr.msk.f32.gmra.mrb[4].mxu1 %vm244_vm0, %v466_v18  ;;  %339 = vmatprep.mubr.f32.mxu0 %v1174_v7 }
  0x1b   : > { %562 = vmatprep.mubr.f32.mxu1 %v1174_v7 }
  0x1d   : > { %1101 = vmatmul.mubr.msk.f32.gmra.mrb[6].mxu0 %vm244_vm0, %v232_v19  ;;  %v1370_v19 = vrot.slane %v1328_v35, %v416_v48 }
  0x1e   : > { %1106 = vmatmul.mubr.msk.f32.gmra.mrb[6].mxu1 %vm244_vm0, %v467_v20  ;;  %734 = vmatprep.mubr.f32.mxu0 %v1174_v7  ;;  %v1373_v20 = vrot.slane %v1328_v35, %v424_v0 }
  0x1f   : > { %924 = vmatprep.mubr.f32.mxu1 %v1174_v7 }
  0x21   : > { %1109 = vmatmul.mubr.msk.f32.vlgmr.msra.gmra.mrb[8].mxu0 %vm244_vm0, %v654_v21 }
  0x22   : > { %1115 = vmatmul.mubr.msk.f32.vlgmr.msra.gmra.mrb[8].mxu1 %vm244_vm0, %v844_v22  ;;  %740 = vmatprep.mubr.f32.mxu0 %v1174_v7  ;;  %v1376_v22 = vrot.slane %v1328_v35, %v408_v63 }
  0x23   : > { %930 = vmatprep.mubr.f32.mxu1 %v1174_v7 }
  0x25   : > { %1110 = vmatmul.mubr.msk.f32.gmra.mrb[10].mxu0 %vm244_vm0, %v655_v23 }
  0x26   : > { %1116 = vmatmul.mubr.msk.f32.gmra.mrb[10].mxu1 %vm244_vm0, %v845_v24  ;;  %746 = vmatprep.mubr.f32.mxu0 %v1174_v7  ;;  %v440_v24 = vsub.s32 6, %v1316_v30 }
  0x27   : > { %936 = vmatprep.mubr.f32.mxu1 %v1174_v7 }
  0x29   : > { %1111 = vmatmul.mubr.msk.f32.gmra.mrb[12].mxu0 %vm244_vm0, %v656_v25 }
  0x2a   : > { %1117 = vmatmul.mubr.msk.f32.gmra.mrb[12].mxu1 %vm244_vm0, %v846_v26  ;;  %752 = vmatprep.mubr.f32.mxu0 %v1174_v7 }
  0x2b   : > { %942 = vmatprep.mubr.f32.mxu1 %v1174_v7 }
  0x2d   : > { %1112 = vmatmul.mubr.msk.f32.gmra.mrb[14].mxu0 %vm244_vm0, %v657_v27 }
  0x2e   : > { %1118 = vmatmul.mubr.msk.f32.gmra.mrb[14].mxu1 %vm244_vm0, %v847_v28 }
  0xe4   : > { %v323_v37 = vpop.f32.mrb[0].mxu0 }
  0xe5   : > { %v546_v38 = vpop.f32.mrb[0].mxu1  ;;  %v325_v39 = vpop.f32.mrb[1].mxu0  ;;  %v324_v47 = vadd.f32 %v323_v37, %v1330_v36 }
  0xe6   : > { %v548_v40 = vpop.f32.mrb[1].mxu1  ;;  %v326_v43 = vadd.f32 %v325_v39, %v1323_v34  ;;  %v547_v4 = vadd.f32 %v546_v38, %v1330_v36  ;;  %v1384_v38 = vrot.slane %v1328_v35, %v448_v1 }
  0xe7   : > { %v549_v44 = vadd.f32 %v548_v40, %v1323_v34  ;;  %v346_v3 = vmax.f32 %v324_v47, 0.0  ;;  %v398_v40 = vadd.f32 %v396_v12, %v390_v11 }
  0xe8   : > { %v347_v49 = vmax.f32 %v326_v43, 0.0  ;;  %v329_v51 = vpop.f32.mrb[2].mxu0  ;;  %v569_v23 = vmax.f32 %v547_v4, 0.0 }
  0xe9   : > { %v570_v50 = vmax.f32 %v549_v44, 0.0  ;;  %v552_v52 = vpop.f32.mrb[2].mxu1  ;;  %v330_v53 = vadd.f32 %v329_v51, %v1330_v36  ;;  %v331_v55 = vpop.f32.mrb[3].mxu0  ;;  %v354_v21 = vmin.f32 %v346_v3, 6.0 }
  0xea   : > { %v553_v54 = vadd.f32 %v552_v52, %v1330_v36  ;;  %v554_v58 = vpop.f32.mrb[3].mxu1  ;;  %v1347_v59 = vmin.f32 %v347_v49, 6.0  ;;  %v332_v61 = vadd.f32 %v331_v55, %v1323_v34  ;;  %v1396_v49 = vmin.f32 %v569_v23, 6.0 }
  0xeb   : > { %v1349_v60 = vmin.f32 %v570_v50, 6.0  ;;  %v555_v62 = vadd.f32 %v554_v58, %v1323_v34  ;;  %v348_v9 = vmax.f32 %v330_v53, 0.0  ;;  %v418_v47 = vmul.f32 %v1370_v19, %v354_v21 }
  0xec   : > { %368 = vst [vmem:[#allocation3 + $0x18] sm:$0xff] %v1347_v59  ;;  %v349_v5 = vmax.f32 %v332_v61, 0.0  ;;  %v335_v7 = vpop.f32.mrb[4].mxu0  ;;  %v571_v10 = vmax.f32 %v553_v54, 0.0  ;;  %v1399_v50 = vrot.slane %v1328_v35, %v440_v24  ;;  %v426_v35 = vmul.f32 %v1373_v20, %v1347_v59  ;;  %v1422_v59 = vld [vmem:[%s1591_s3 + $0x8] ss:$0 sm:$0xff] }
  0xed   : > { %591 = vst [vmem:[#allocation3 + $0x58] sm:$0xff] %v1349_v60  ;;  %v572_v6 = vmax.f32 %v555_v62, 0.0  ;;  %v558_v8 = vpop.f32.mrb[4].mxu1  ;;  %v337_v13 = vpop.f32.mrb[5].mxu0  ;;  %v336_v27 = vadd.f32 %v335_v7, %v1330_v36  ;;  %v356_v37 = vmin.f32 %v348_v9, 6.0 }
  0xee   : > { %v560_v14 = vpop.f32.mrb[5].mxu1  ;;  %v1363_v15 = vmin.f32 %v349_v5, 6.0  ;;  %v338_v17 = vadd.f32 %v337_v13, %v1323_v34  ;;  %v559_v28 = vadd.f32 %v558_v8, %v1330_v36  ;;  %v1386_v39 = vmin.f32 %v571_v10, 6.0 }
  0xef   : > { %v1365_v16 = vmin.f32 %v572_v6, 6.0  ;;  %v561_v18 = vadd.f32 %v560_v14, %v1323_v34  ;;  %v350_v53 = vmax.f32 %v336_v27, 0.0  ;;  %v389_v61 = vmul.f32 %v1333_v41, %v356_v37 }
  0xf0   : > { %369 = vst [vmem:[#allocation3 + $0x28] sm:$0xff] %v1363_v15  ;;  %v341_v25 = vpop.f32.mrb[6].mxu0  ;;  %v351_v29 = vmax.f32 %v338_v17, 0.0  ;;  %v573_v54 = vmax.f32 %v559_v28, 0.0  ;;  %v606_v62 = vmul.f32 %v1386_v39, %v1333_v41  ;;  %v397_v1 = vmul.f32 %v1357_v2, %v1363_v15 }
  0xf1   : > { %592 = vst [vmem:[#allocation3 + $0x68] sm:$0xff] %v1365_v16  ;;  %v564_v26 = vpop.f32.mrb[6].mxu1  ;;  %v574_v31 = vmax.f32 %v561_v18, 0.0  ;;  %v343_v32 = vpop.f32.mrb[7].mxu0  ;;  %v342_v55 = vadd.f32 %v341_v25, %v1330_v36  ;;  %v610_v10 = vmul.f32 %v1365_v16, %v1357_v2  ;;  %v358_v13 = vmin.f32 %v350_v53, 6.0 }
  0xf2   : > { %v566_v33 = vpop.f32.mrb[7].mxu1  ;;  %v1388_v43 = vmin.f32 %v351_v29, 6.0  ;;  %v344_v45 = vadd.f32 %v343_v32, %v1323_v34  ;;  %v565_v56 = vadd.f32 %v564_v26, %v1330_v36  ;;  %v581_v14 = vmin.f32 %v573_v54, 6.0 }
  0xf3   : > { %v400_v30 = vld [vmem:[#allocation3 + $0x17] sm:$0xff]  ;;  %v1390_v44 = vmin.f32 %v574_v31, 6.0  ;;  %v567_v46 = vadd.f32 %v566_v33, %v1323_v34  ;;  %v352_v17 = vmax.f32 %v342_v55, 0.0  ;;  %v450_v29 = vmul.f32 %v1384_v38, %v356_v37 }
  0xf4   : > { %v410_v48 = vmul.f32 %v1376_v22, %v400_v30  ;;  %v1401_v51 = vpop.f32.mrb[8].mxu0  ;;  %370 = vst [vmem:[#allocation3 + $0x38] sm:$0xff] %v1388_v43  ;;  %v353_v4 = vmax.f32 %v344_v45, 0.0  ;;  %v575_v18 = vmax.f32 %v565_v56, 0.0  ;;  %v613_v24 = vld [vmem:[#allocation3 + $0x57] sm:$0xff]  ;;  %v458_v45 = vmul.f32 %v1422_v59, %v1363_v15 }
  0xf5   : > { %v1403_v52 = vpop.f32.mrb[8].mxu1  ;;  %593 = vst [vmem:[#allocation3 + $0x78] sm:$0xff] %v1390_v44  ;;  %v738_v57 = vpop.f32.mrb[9].mxu0  ;;  %v576_v5 = vmax.f32 %v567_v46, 0.0  ;;  %v1445_v55 = vmul.f32 %v613_v24, %v1376_v22 }
  0xf6   : > { %v928_v58 = vpop.f32.mrb[9].mxu1  ;;  %v412_v63 = vadd.f32 %v410_v48, %v398_v40  ;;  %v739_v6 = vadd.f32 %v738_v57, %v1323_v34  ;;  %v361_v31 = vmin.f32 %v353_v4, 6.0  ;;  %v360_v57 = vmin.f32 %v352_v17, 6.0 }
  0xf7   : > { %v373_v0 = vld [vmem:[#allocation3 + $0x27] sm:$0xff]  ;;  %v584_v32 = vmin.f32 %v576_v5, 6.0  ;;  %v737_v5 = vadd.f32 %v1401_v51, %v1330_v36 }
  0xf8   : > { %v1416_v3 = vld [vmem:[#allocation3 + $0x67] sm:$0xff]  ;;  %v383_v7 = vmul.f32 %v1336_v42, %v373_v0  ;;  %v420_v8 = vadd.f32 %v418_v47, %v412_v63  ;;  %v1429_v11 = vpop.f32.mrb[10].mxu0  ;;  %v442_v27 = vmul.f32 %v1399_v50, %v373_v0  ;;  %v760_v33 = vmax.f32 %v739_v6, 0.0  ;;  %371 = vst [vmem:[#allocation3 + $0x48] sm:$0xff] %v361_v31 }
  0xf9   : > { %v604_v9 = vmul.f32 %v1416_v3, %v1336_v42  ;;  %v1431_v12 = vpop.f32.mrb[10].mxu1  ;;  %v744_v21 = vpop.f32.mrb[11].mxu0  ;;  %594 = vst [vmem:[#allocation3 + $0x88] sm:$0xff] %v584_v32  ;;  %v624_v63 = vmul.f32 %v581_v14, %v1370_v19  ;;  %v583_v0 = vmin.f32 %v575_v18, 6.0  ;;  %v451_v24 = vmul.f32 %v1384_v38, %v360_v57 }
  0xfa   : > { %v1433_v23 = vpop.f32.mrb[11].mxu1  ;;  %v391_v25 = vadd.f32 %v389_v61, %v383_v7  ;;  %v428_v26 = vadd.f32 %v426_v35, %v420_v8  ;;  %v1462_v6 = vmin.f32 %v760_v33, 6.0  ;;  %v427_v8 = vmul.f32 %v1373_v20, %v1388_v43 }
  0xfb   : > { %v608_v28 = vadd.f32 %v606_v62, %v604_v9  ;;  %v401_v47 = vld [vmem:[#allocation3 + $0x37] sm:$0xff]  ;;  %v419_v62 = vmul.f32 %v1370_v19, %v358_v13  ;;  %v628_v9 = vmul.f32 %v1390_v44, %v1373_v20  ;;  %v605_v51 = vmul.f32 %v1333_v41, %v360_v57 }
  0xfc   : > { %v399_v40 = vadd.f32 %v397_v1, %v391_v25  ;;  %v444_v30 = vadd.f32 %v442_v27, %v428_v26  ;;  %v614_v48 = vld [vmem:[#allocation3 + $0x77] sm:$0xff]  ;;  %v1440_v53 = vpop.f32.mrb[12].mxu0  ;;  %v411_v37 = vmul.f32 %v1376_v22, %v401_v47  ;;  %781 = vst [vmem:[#allocation3 + $0x98] sm:$0xff] %v1462_v6  ;;  %v644_v44 = vmul.f32 %v583_v0, %v1384_v38 }
  0xfd   : > { %v612_v46 = vadd.f32 %v610_v10, %v608_v28  ;;  %v1442_v54 = vpop.f32.mrb[12].mxu1  ;;  %v620_v56 = vmul.f32 %v614_v48, %v1376_v22  ;;  %v1449_v35 = vpop.f32.mrb[13].mxu0  ;;  %v929_v10 = vadd.f32 %v928_v58, %v1323_v34  ;;  %v795_v58 = vmul.f32 %v583_v0, %v1333_v41 }
  0xfe   : > { %v1451_v15 = vpop.f32.mrb[13].mxu1  ;;  %v452_v61 = vadd.f32 %v450_v29, %v444_v30  ;;  %v413_v1 = vadd.f32 %v411_v37, %v399_v40  ;;  %v745_v27 = vadd.f32 %v744_v21, %v1323_v34  ;;  %v459_v33 = vmul.f32 %v1422_v59, %v361_v31 }
  0xff   : > { %v622_v4 = vadd.f32 %v620_v56, %v612_v46  ;;  %v950_v26 = vmax.f32 %v929_v10, 0.0  ;;  %v759_v40 = vmax.f32 %v737_v5, 0.0  ;;  %v432_v30 = vld [vmem:[#allocation3 + $0x47] sm:$0xff]  ;;  %v743_v47 = vadd.f32 %v1429_v11, %v1330_v36 }
 0x100   : > { %v460_v7 = vadd.f32 %v458_v45, %v452_v61  ;;  %v1469_v13 = vpop.f32.mrb[14].mxu0  ;;  %v421_v17 = vadd.f32 %v419_v62, %v413_v1  ;;  %v633_v45 = vld [vmem:[#allocation3 + $0x87] sm:$0xff]  ;;  %v762_v48 = vmax.f32 %v745_v27, 0.0  ;;  %v935_v37 = vadd.f32 %v1433_v23, %v1323_v34 }
 0x101   : > { %v1471_v14 = vpop.f32.mrb[14].mxu1  ;;  %v626_v18 = vadd.f32 %v624_v63, %v622_v4  ;;  %v1476_v25 = vpop.f32.mrb[15].mxu0  ;;  %v1485_v46 = vmin.f32 %v950_v26, 6.0  ;;  %v443_v56 = vmul.f32 %v1399_v50, %v432_v30  ;;  %v603_v21 = vmul.f32 %v432_v30, %v1336_v42 }
 0x102   : > { %v1478_v43 = vpop.f32.mrb[15].mxu1  ;;  %462 = vst [vmem:[%s1458_s22] sm:$0xff] %v460_v7  ;;  %v429_v28 = vadd.f32 %v427_v8, %v421_v17  ;;  %v640_v57 = vmul.f32 %v633_v45, %v1399_v50  ;;  %v793_v61 = vmul.f32 %v633_v45, %v1336_v42  ;;  %v609_v62 = vmul.f32 %v1357_v2, %v361_v31 }
 0x103   : > { %v630_v29 = vadd.f32 %v628_v9, %v626_v18  ;;  %v648_v63 = vmul.f32 %v1422_v59, %v584_v32  ;;  %v799_v0 = vmul.f32 %v584_v32, %v1357_v2  ;;  %971 = vst [vmem:[#allocation3 + $0xd8] sm:$0xff] %v1485_v46  ;;  %v933_v11 = vadd.f32 %v1431_v12, %v1330_v36  ;;  %v803_v8 = vld [vmem:[#allocation3 + $0x97] sm:$0xff] }
 0x104   : > { %v445_v23 = vadd.f32 %v443_v56, %v429_v28  ;;  %v607_v1 = vadd.f32 %v605_v51, %v603_v21  ;;  %v797_v5 = vadd.f32 %v795_v58, %v793_v61  ;;  %v767_v7 = vmin.f32 %v759_v40, 6.0 }
 0x105   : > { %v642_v4 = vadd.f32 %v640_v57, %v630_v29  ;;  %v761_v9 = vmax.f32 %v743_v47, 0.0  ;;  %v770_v10 = vmin.f32 %v762_v48, 6.0  ;;  %v952_v17 = vmax.f32 %v935_v37, 0.0 }
 0x106   : > { %v453_v18 = vadd.f32 %v451_v24, %v445_v23  ;;  %v611_v31 = vadd.f32 %v609_v62, %v607_v1  ;;  %v801_v27 = vadd.f32 %v799_v0, %v797_v5  ;;  %v623_v32 = vmul.f32 %v1396_v49, %v1370_v19 }
 0x107   : > { %v646_v26 = vadd.f32 %v644_v44, %v642_v4  ;;  %v809_v30 = vmul.f32 %v803_v8, %v1376_v22  ;;  %v951_v12 = vmax.f32 %v933_v11, 0.0  ;;  %782 = vst [vmem:[#allocation3 + $0xa8] sm:$0xff] %v770_v10  ;;  %v1504_v51 = vmin.f32 %v952_v17, 6.0 }
 0x108   : > { %v627_v58 = vmul.f32 %v1349_v60, %v1373_v20  ;;  %v461_v28 = vadd.f32 %v459_v33, %v453_v18  ;;  %v621_v24 = vadd.f32 %v1445_v55, %v611_v31  ;;  %v643_v44 = vmul.f32 %v1386_v39, %v1384_v38 }
 0x109   : > { %v650_v29 = vadd.f32 %v648_v63, %v646_v26  ;;  %v813_v40 = vmul.f32 %v767_v7, %v1370_v19  ;;  %v811_v49 = vadd.f32 %v809_v30, %v801_v27  ;;  %v769_v45 = vmin.f32 %v761_v9, 6.0  ;;  %972 = vst [vmem:[#allocation3 + $0xe8] sm:$0xff] %v1504_v51 }
 0x10a   : > { %v647_v47 = vmul.f32 %v1422_v59, %v1365_v16  ;;  %463 = vst [vmem:[%s1458_s22 + $0x8] sm:$0xff] %v461_v28  ;;  %v625_v48 = vadd.f32 %v623_v32, %v621_v24  ;;  %v751_v60 = vadd.f32 %v1449_v35, %v1323_v34  ;;  %v941_v55 = vadd.f32 %v1451_v15, %v1323_v34 }
 0x10b   : > { %1108 = vst [vmem:[%s1458_s22 + $0x18] sm:$0xff] %v650_v29  ;;  %v639_v39 = vmul.f32 %v1416_v3, %v1399_v50  ;;  %v815_v33 = vadd.f32 %v813_v40, %v811_v49  ;;  %v817_v37 = vmul.f32 %v1462_v6, %v1373_v20  ;;  %v1525_v56 = vmin.f32 %v951_v12, 6.0 }
 0x10c   : > { %v629_v21 = vadd.f32 %v627_v58, %v625_v48  ;;  %v749_v16 = vadd.f32 %v1440_v53, %v1330_v36  ;;  %v764_v57 = vmax.f32 %v751_v60, 0.0  ;;  %v954_v61 = vmax.f32 %v941_v55, 0.0 }
 0x10d   : > { %v819_v62 = vadd.f32 %v817_v37, %v815_v33  ;;  %v796_v35 = vmul.f32 %v769_v45, %v1333_v41  ;;  %v833_v15 = vmul.f32 %v769_v45, %v1384_v38  ;;  %v757_v3 = vadd.f32 %v1476_v25, %v1323_v34 }
 0x10e   : > { %v641_v63 = vadd.f32 %v639_v39, %v629_v21  ;;  %v787_v0 = vld [vmem:[#allocation3 + $0xa7] sm:$0xff]  ;;  %v939_v6 = vadd.f32 %v1442_v54, %v1330_v36  ;;  %v772_v11 = vmin.f32 %v764_v57, 6.0  ;;  %v962_v23 = vmin.f32 %v954_v61, 6.0 }
 0x10f   : > { %v986_v53 = vmul.f32 %v1525_v56, %v1333_v41  ;;  %v794_v1 = vmul.f32 %v787_v0, %v1336_v42  ;;  %v829_v4 = vmul.f32 %v787_v0, %v1399_v50  ;;  %v755_v5 = vadd.f32 %v1469_v13, %v1330_v36 }
 0x110   : > { %v645_v7 = vadd.f32 %v643_v44, %v641_v63  ;;  %v800_v25 = vmul.f32 %v770_v10, %v1357_v2  ;;  %v837_v8 = vmul.f32 %v1422_v59, %v770_v10  ;;  %v1543_v9 = vld [vmem:[#allocation3 + $0xe7] sm:$0xff]  ;;  %783 = vst [vmem:[#allocation3 + $0xb8] sm:$0xff] %v772_v11  ;;  %973 = vst [vmem:[#allocation3 + $0xf8] sm:$0xff] %v962_v23  ;;  %v766_v54 = vmax.f32 %v757_v3, 0.0  ;;  %v993_v3 = vld [vmem:[#allocation3 + $0xd7] sm:$0xff] }
 0x111   : > { %v798_v17 = vadd.f32 %v796_v35, %v794_v1  ;;  %v831_v18 = vadd.f32 %v829_v4, %v819_v62  ;;  %v984_v31 = vmul.f32 %v1543_v9, %v1336_v42  ;;  %v763_v26 = vmax.f32 %v749_v16, 0.0 }
 0x112   : > { %v649_v27 = vadd.f32 %v647_v47, %v645_v7  ;;  %v990_v13 = vmul.f32 %v1504_v51, %v1357_v2  ;;  %v953_v32 = vmax.f32 %v939_v6, 0.0  ;;  %v774_v30 = vmin.f32 %v766_v54, 6.0 }
 0x113   : > { %v802_v10 = vadd.f32 %v800_v25, %v798_v17  ;;  %v835_v12 = vadd.f32 %v833_v15, %v831_v18  ;;  %v988_v58 = vadd.f32 %v986_v53, %v984_v31  ;;  %v765_v28 = vmax.f32 %v755_v5, 0.0 }
 0x114   : > { %1107 = vst [vmem:[%s1458_s22 + $0x10] sm:$0xff] %v649_v27  ;;  %784 = vst [vmem:[#allocation3 + $0xc8] sm:$0xff] %v774_v30  ;;  %v947_v24 = vadd.f32 %v1478_v43, %v1323_v34  ;;  %v927_v29 = vadd.f32 %v1403_v52, %v1330_v36  ;;  %v771_v49 = vmin.f32 %v763_v26, 6.0  ;;  %v961_v45 = vmin.f32 %v953_v32, 6.0 }
 0x115   : > { %v839_v44 = vadd.f32 %v837_v8, %v835_v12  ;;  %v992_v40 = vadd.f32 %v990_v13, %v988_v58  ;;  %v773_v55 = vmin.f32 %v765_v28, 6.0  ;;  %v945_v37 = vadd.f32 %v1471_v14, %v1330_v36 }
 0x116   : > { %v956_v47 = vmax.f32 %v947_v24, 0.0  ;;  %v949_v43 = vmax.f32 %v927_v29, 0.0  ;;  %v814_v52 = vmul.f32 %v771_v49, %v1370_v19  ;;  %v1004_v21 = vmul.f32 %v961_v45, %v1370_v19 }
 0x117   : > { %1113 = vst [vmem:[%s1458_s22 + $0x20] sm:$0xff] %v839_v44  ;;  %v804_v48 = vld [vmem:[#allocation3 + $0xb7] sm:$0xff]  ;;  %v818_v61 = vmul.f32 %v772_v11, %v1373_v20  ;;  %v1008_v62 = vmul.f32 %v962_v23, %v1373_v20  ;;  %v985_v35 = vmul.f32 %v773_v55, %v1333_v41  ;;  %v955_v14 = vmax.f32 %v945_v37, 0.0 }
 0x118   : > { %v994_v60 = vld [vmem:[#allocation3 + $0xf7] sm:$0xff]  ;;  %v810_v39 = vmul.f32 %v804_v48, %v1376_v22  ;;  %v964_v34 = vmin.f32 %v956_v47, 6.0  ;;  %v957_v6 = vmin.f32 %v949_v43, 6.0  ;;  %v989_v53 = vmul.f32 %v774_v30, %v1357_v2 }
 0x119   : > { %v1000_v33 = vmul.f32 %v994_v60, %v1376_v22  ;;  %v999_v11 = vmul.f32 %v993_v3, %v1376_v22  ;;  %v834_v23 = vmul.f32 %v773_v55, %v1384_v38  ;;  %v963_v8 = vmin.f32 %v955_v14, 6.0 }
 0x11a   : > { %v812_v16 = vadd.f32 %v810_v39, %v802_v10  ;;  %974 = vst [vmem:[#allocation3 + $0x108] sm:$0xff] %v964_v34  ;;  %v1003_v54 = vmul.f32 %v957_v6, %v1370_v19  ;;  %v838_v18 = vmul.f32 %v1422_v59, %v774_v30  ;;  %v1007_v26 = vmul.f32 %v1485_v46, %v1373_v20 }
 0x11b   : > { %v1002_v57 = vadd.f32 %v1000_v33, %v992_v40  ;;  %v823_v15 = vld [vmem:[#allocation3 + $0xc7] sm:$0xff]  ;;  %v1024_v13 = vmul.f32 %v963_v8, %v1384_v38  ;;  %v1019_v19 = vmul.f32 %v1543_v9, %v1399_v50  ;;  %v1028_v30 = vmul.f32 %v1422_v59, %v964_v34 }
 0x11c   : > { %v816_v63 = vadd.f32 %v814_v52, %v812_v16  ;;  %v983_v36 = vmul.f32 %v823_v15, %v1336_v42  ;;  %v830_v5 = vmul.f32 %v823_v15, %v1399_v50  ;;  %v1023_v58 = vmul.f32 %v1525_v56, %v1384_v38 }
 0x11d   : > { %v1006_v0 = vadd.f32 %v1004_v21, %v1002_v57  ;;  %v1027_v20 = vmul.f32 %v1422_v59, %v1504_v51 }
 0x11e   : > { %v820_v1 = vadd.f32 %v818_v61, %v816_v63  ;;  %v987_v7 = vadd.f32 %v985_v35, %v983_v36 }
 0x11f   : > { %v1010_v4 = vadd.f32 %v1008_v62, %v1006_v0 }
 0x120   : > { %v832_v41 = vadd.f32 %v830_v5, %v820_v1  ;;  %v991_v25 = vadd.f32 %v989_v53, %v987_v7 }
 0x121   : > { %v1013_v42 = vld [vmem:[#allocation3 + $0x107] sm:$0xff] }
 0x122   : > { %v836_v17 = vadd.f32 %v834_v23, %v832_v41  ;;  %v1001_v2 = vadd.f32 %v999_v11, %v991_v25  ;;  %v1020_v31 = vmul.f32 %v1013_v42, %v1399_v50 }
 0x124   : > { %v840_v22 = vadd.f32 %v838_v18, %v836_v17  ;;  %v1005_v27 = vadd.f32 %v1003_v54, %v1001_v2  ;;  %v1022_v32 = vadd.f32 %v1020_v31, %v1010_v4 }
 0x126   : > { %1114 = vst [vmem:[%s1458_s22 + $0x28] sm:$0xff] %v840_v22  ;;  %v1009_v10 = vadd.f32 %v1007_v26, %v1005_v27  ;;  %v1026_v12 = vadd.f32 %v1024_v13, %v1022_v32 }
 0x128   : > { %v1021_v28 = vadd.f32 %v1019_v19, %v1009_v10  ;;  %v1030_v24 = vadd.f32 %v1028_v30, %v1026_v12 }
 0x12a   : > { %v1025_v46 = vadd.f32 %v1023_v58, %v1021_v28  ;;  %1120 = vst [vmem:[%s1458_s22 + $0x38] sm:$0xff] %v1030_v24 }
 0x12c   : > { %v1029_v29 = vadd.f32 %v1027_v20, %v1025_v46 }
 0x12e   : > { %1119 = vst [vmem:[%s1458_s22 + $0x30] sm:$0xff] %v1029_v29 }
 0x12f PF: > { %s14_s15 = sadd.s32 1, %s1172_s15  }
 0x130   : > { %p11_p4 = scmp.ge.s32.totalorder %s14_s15, 4  }
 0x132   :  { %13 = sbr.rel (!%p11_p4) target bundleno = 1 (0x1), region = 91 }

</bundles_post_ra>
